<compile_context>
chip_gen: v6e
topology: v6e:2x2x1
jax: 0.10.0
libtpu: 0.0.40
codegen_flags: <defaults>
</compile_context>

<pallas_src>
import functools
import math

import jax
import jax.numpy as jnp
from jax import lax
from jax.experimental import pallas as pl
from jax.experimental.pallas import tpu as pltpu


# ----------------------------- kernels --------------------------------------


def _pe_add_kernel(x_ref, pe_ref, o_ref):
    # x_ref / o_ref: (B, ts, E)   pe_ref: (ts, E)
    # eval-mode dropout == identity
    o_ref[...] = x_ref[...] + pe_ref[...][None, :, :]


def _pe_add_dropout_kernel(seed_ref, x_ref, pe_ref, o_ref, *,
                           keep_threshold, inv_keep, seq_block, seq_len):
    # Training-mode inverted dropout.  Mask = Bernoulli(1 - p) derived from a
    # stateless uint32 hash of the absolute element index + seed, compared
    # against an integer threshold (P(keep) = 1 - p at 32-bit resolution).
    y = x_ref[...] + pe_ref[...][None, :, :]
    B, ts, E = y.shape

    s0 = (pl.program_id(0) * seq_block).astype(jnp.uint32)
    b_idx = lax.broadcasted_iota(jnp.uint32, y.shape, 0)
    s_idx = lax.broadcasted_iota(jnp.uint32, y.shape, 1) + s0
    e_idx = lax.broadcasted_iota(jnp.uint32, y.shape, 2)
    flat = (b_idx * jnp.uint32(seq_len) + s_idx) * jnp.uint32(E) + e_idx

    # murmur3-style finalizer (good avalanche, pure VPU int ops, wraps mod 2^32)
    h = flat ^ (seed_ref[0].astype(jnp.uint32) * jnp.uint32(0x9E3779B9))
    h = (h ^ (h >> 16)) * jnp.uint32(0x7FEB352D)
    h = (h ^ (h >> 15)) * jnp.uint32(0x846CA68B)
    h = h ^ (h >> 16)

    keep = h >= jnp.uint32(keep_threshold)
    scale = jnp.asarray(inv_keep, dtype=y.dtype)
    o_ref[...] = jnp.where(keep, y * scale, jnp.zeros_like(y))


# ----------------------------- wrapper ---------------------------------------


def _choose_seq_block(seq_len, bytes_per_seq_row, target_bytes=2 * 1024 * 1024):
    """Pick a seq-axis tile: a multiple of 8 that divides seq_len, sized so one
    activation block is ~target_bytes (keeps double-buffered VMEM << 16 MiB)."""
    if seq_len * bytes_per_seq_row <= target_bytes:
        return seq_len
    rows = int(max(8, min(seq_len, (target_bytes // bytes_per_seq_row) // 8 * 8)))
    while rows >= 8:
        if seq_len % rows == 0:
            return rows
        rows -= 8
    return seq_len  # no multiple-of-8 divisor -> single block (full array dims)


def positional_encoding_forward(x, pe_table, *, dropout_p=0.1,
                                training=False, seed=0):
    """dropout(x + pe_table[:S]) with x in the PyTorch (S, B, E) layout.

    pe_table: (max_len, E) -- either the fixed sinusoidal buffer
    (PositionalEncoding) or the nn.Embedding weight
    (PositionalEncodingWithEmbedding).
    """
    S, B, E = x.shape
    max_len, E2 = pe_table.shape
    assert E == E2 and S <= max_len

    pe = pe_table.astype(x.dtype)         # one-time cast (no-op if dtypes match)
    xb = jnp.transpose(x, (1, 0, 2))      # (B, S, E): lane-dense blocks

    ts = _choose_seq_block(S, B * E * x.dtype.itemsize)
    grid = (S // ts,)
    out_shape = jax.ShapeDtypeStruct((B, S, E), x.dtype)

    # index_maps take (grid_i, *prefetch_refs); *_ absorbs the optional seed ref
    x_spec = pl.BlockSpec((B, ts, E), lambda i, *_: (0, i, 0))
    pe_spec = pl.BlockSpec((ts, E), lambda i, *_: (i, 0))
    o_spec = pl.BlockSpec((B, ts, E), lambda i, *_: (0, i, 0))
    params = pltpu.CompilerParams(dimension_semantics=("parallel",))

    if (not training) or dropout_p == 0.0:
        ob = pl.pallas_call(
            _pe_add_kernel,
            out_shape=out_shape,
            grid_spec=pltpu.PrefetchScalarGridSpec(
                num_scalar_prefetch=0, grid=grid,
                in_specs=[x_spec, pe_spec], out_specs=o_spec),
            compiler_params=params,
        )(xb, pe)
    else:
        assert 0.0 < dropout_p < 1.0
        keep_threshold = min(int(round(dropout_p * 2.0 ** 32)), 2 ** 32 - 1)
        kernel = functools.partial(
            _pe_add_dropout_kernel,
            keep_threshold=keep_threshold,
            inv_keep=1.0 / (1.0 - dropout_p),
            seq_block=ts,
            seq_len=S)
        seed_arr = jnp.asarray([seed], dtype=jnp.int32)
        ob = pl.pallas_call(
            kernel,
            out_shape=out_shape,
            grid_spec=pltpu.PrefetchScalarGridSpec(
                num_scalar_prefetch=1, grid=grid,
                in_specs=[x_spec, pe_spec], out_specs=o_spec),
            compiler_params=params,
        )(seed_arr, xb, pe)

    return jnp.transpose(ob, (1, 0, 2))   # back to the PyTorch (S, B, E) layout


def positional_encoding_with_embedding(x, emb_weight, **kw):
    """PositionalEncodingWithEmbedding.forward"""
    return positional_encoding_forward(x, emb_weight, **kw)


def positional_encoding(x, sine_table, **kw):
    """PositionalEncoding.forward (pass the precomputed sinusoidal buffer)."""
    return positional_encoding_forward(x, sine_table, **kw)


def make_sinusoidal_pe(max_len, embedding_size, dtype=jnp.float32):
    """The constant `pe` buffer of PositionalEncoding, as a (max_len, E) table."""
    position = jnp.arange(max_len, dtype=jnp.float32)[:, None]
    div_term = jnp.exp(jnp.arange(0, embedding_size, 2, dtype=jnp.float32)
                       * (-math.log(10000.0) / embedding_size))
    pe = jnp.zeros((max_len, embedding_size), dtype=jnp.float32)
    pe = pe.at[:, 0::2].set(jnp.sin(position * div_term))
    pe = pe.at[:, 1::2].set(jnp.cos(position * div_term))
    return pe.astype(dtype)


# ----------------------------- main ------------------------------------------

if __name__ == "__main__":
    # Small shapes consistent with the module's forward: (seq, batch, emb).
    # E=128 keeps the lane dimension full-width.
    SEQ, BATCH, EMB = 16, 4, 128
    MAX_LEN = 64      # module default is 500; kept small for the synthetic test
    P = 0.1

    key = jax.random.PRNGKey(0)
    kx, kw = jax.random.split(key)
    x = jax.random.normal(kx, (SEQ, BATCH, EMB), dtype=jnp.float32)
    emb_w = jax.random.normal(kw, (MAX_LEN, EMB), dtype=jnp.float32)
    sine = make_sinusoidal_pe(MAX_LEN, EMB)

    # --- learnable positional encoding, eval mode (dropout == identity) ------
    out = jax.block_until_ready(
        positional_encoding_with_embedding(x, emb_w, dropout_p=P, training=False))
    ref = x + emb_w[:SEQ][:, None, :]
    assert out.shape == (SEQ, BATCH, EMB)
    assert jnp.allclose(out, ref, atol=1e-6, rtol=1e-6)

    # --- fixed sinusoidal positional encoding, eval mode ---------------------
    out_s = jax.block_until_ready(
        positional_encoding(x, sine, dropout_p=P, training=False))
    ref_s = x + sine[:SEQ][:, None, :]
    assert jnp.allclose(out_s, ref_s, atol=1e-6, rtol=1e-6)

    # --- training mode: inverted dropout --------------------------------------
    # (RNG stream intentionally differs from PyTorch; semantics match
    #  nn.Dropout: each element kept with prob 1-p and scaled by 1/(1-p).)
    out_t = jax.block_until_ready(
        positional_encoding_with_embedding(
            x, emb_w, dropout_p=P, training=True, seed=123))
    scale = 1.0 / (1.0 - P)
    kept = out_t != 0.0
    # every surviving element equals (x + pe) / (1 - p); dropped elements are 0
    assert jnp.allclose(out_t, jnp.where(kept, ref * scale, 0.0),
                        atol=1e-5, rtol=1e-5)
    frac = float(jnp.mean(kept.astype(jnp.float32)))
    assert 0.5 < frac <= 1.0   # loose sanity check on keep rate (~0.9 expected)

    print("KERNEL_OK")
</pallas_src>

<mosaic_0001>
module attributes {stable_mosaic.version = 11 : i64} {
  func.func @_pe_add_kernel(%arg0: i32, %arg1: memref<4x16x128xf32, #tpu.memory_space<vmem>>, %arg2: memref<16x128xf32, #tpu.memory_space<vmem>>, %arg3: memref<4x16x128xf32, #tpu.memory_space<vmem>>) attributes {dimension_semantics = [#tpu.dimension_semantics<parallel>], iteration_bounds = array<i64: 1>, scalar_prefetch = 0 : i64, scratch_operands = 0 : i64, tpu.core_type = #tpu.core_type<tc>, window_params = [{transform_indices = @transform_0, window_bounds = array<i64: 4, 16, 128>}, {transform_indices = @transform_1, window_bounds = array<i64: 16, 128>}, {transform_indices = @transform_2, window_bounds = array<i64: 4, 16, 128>}]} {
    %c0 = arith.constant 0 : index
    %c0_0 = arith.constant 0 : index
    %c0_1 = arith.constant 0 : index
    %0 = vector.load %arg1[%c0, %c0_0, %c0_1] : memref<4x16x128xf32, #tpu.memory_space<vmem>>, vector<4x16x128xf32>
    %c0_2 = arith.constant 0 : index
    %c0_3 = arith.constant 0 : index
    %1 = vector.load %arg2[%c0_2, %c0_3] : memref<16x128xf32, #tpu.memory_space<vmem>>, vector<16x128xf32>
    %2 = vector.shape_cast %1 : vector<16x128xf32> to vector<1x16x128xf32>
    %3 = vector.broadcast %2 : vector<1x16x128xf32> to vector<4x16x128xf32>
    %4 = arith.addf %0, %3 : vector<4x16x128xf32>
    %c0_4 = arith.constant 0 : index
    %c0_5 = arith.constant 0 : index
    %c0_6 = arith.constant 0 : index
    %5 = vector.load %arg3[%c0_4, %c0_5, %c0_6] : memref<4x16x128xf32, #tpu.memory_space<vmem>>, vector<4x16x128xf32>
    tpu.vector_store %arg3[%c0_4, %c0_5, %c0_6], %4 {strides = array<i32>} : memref<4x16x128xf32, #tpu.memory_space<vmem>>, vector<4x16x128xf32>,
    return
  }
  func.func @transform_0(%arg0: i32) -> (i32, i32, i32) {
    %c0_i32 = arith.constant 0 : i32
    %c0_i32_0 = arith.constant 0 : i32
    %c0_i32_1 = arith.constant 0 : i32
    return %c0_i32, %arg0, %c0_i32_0 : i32, i32, i32
  }
  func.func @transform_1(%arg0: i32) -> (i32, i32) {
    %c0_i32 = arith.constant 0 : i32
    %c0_i32_0 = arith.constant 0 : i32
    return %arg0, %c0_i32 : i32, i32
  }
  func.func @transform_2(%arg0: i32) -> (i32, i32, i32) {
    %c0_i32 = arith.constant 0 : i32
    %c0_i32_0 = arith.constant 0 : i32
    %c0_i32_1 = arith.constant 0 : i32
    return %c0_i32, %arg0, %c0_i32_0 : i32, i32, i32
  }
}

</mosaic_0001>

<bundles_post_ra>
// kernel: tpu_custom_call.1
= control target key start
LH: loop header
LB: loop body
LE: loop exit
PB: predicated region body
PF: predicated region fallthrough
CT: control target
= control target key end

     0   :  { %7 = vsyncpa [#allocation3], 0  ;;  %s193_s0 = inlined_call_operand.hbm [shape: f32[4,16,128], index: 0, kind: input, shape index: {}]   ;;  %s194_s1 = inlined_call_operand.hbm [shape: f32[64,128], index: 1, kind: input, shape index: {}]   ;;  %s195_s2 = inlined_call_operand.hbm [shape: f32[4,16,128], index: 2, kind: output, shape index: {}]  }
   0x1   :  { %8 = vsyncpa [#allocation6], 0 }
   0x2   :  { %9 = vsyncpa [#allocation4], 0  ;;  %s155_s9 = smov [#allocation2]  }
   0x3   :  { %s15_s10 = sshll.u32 %s155_s9, 4  ;;  %s16_s10 = int_to_ptr.vmem [resolvable:$true] %s15_s10 }
   0x4   :  { %s97_s11 = scalar_lea.vmem %s16_s10, 1024  ;;  %p102_p1 = scmp.lt.s32.totalorder %s16_s10, %s16_s10 }
   0x5   :  { %p98_p0 = scmp.ne.s32.totalorder %s16_s10, %s97_s11  ;;  %p103_p2 = scmp.lt.s32.totalorder %s97_s11, %s97_s11 }
   0x7   :  { %p104_p3 = por %p103_p2, %p102_p1 }
   0x9   :  { %p105_p4 = pnand %p104_p3, %p98_p0 }
   0xb   :  { %108 = shalt.err (!%p105_p4)
}
   0xc   :  { %s156_s12 = smov 128   ;;  %s157_s13 = smov 8  }
   0xd   :  { %21 = dma.hbm_to_vmem [thread:$0]  %s193_s0, 1024, %s16_s10, [#allocation3], %s156_s12, %s156_s12, %s157_s13  }
   0xe   :  { %s158_s16 = smov [#allocation5]  }
   0xf   :  { %s27_s17 = sshll.u32 %s158_s16, 4  ;;  %s28_s17 = int_to_ptr.vmem [resolvable:$true] %s27_s17 }
  0x10   :  { %s117_s18 = scalar_lea.vmem %s28_s17, 256  ;;  %p122_p6 = scmp.lt.s32.totalorder %s28_s17, %s28_s17 }
  0x11   :  { %p118_p5 = scmp.ne.s32.totalorder %s28_s17, %s117_s18  ;;  %p123_p7 = scmp.lt.s32.totalorder %s117_s18, %s117_s18 }
  0x13   :  { %p124_p8 = por %p123_p7, %p122_p6 }
  0x15   :  { %p125_p9 = pnand %p124_p8, %p118_p5 }
  0x17   :  { %128 = shalt.err (!%p125_p9)
}
  0x18   :  { %33 = dma.hbm_to_vmem [thread:$0]  %s194_s1, 256, %s28_s17, [#allocation6], %s156_s12, %s156_s12, %s157_s13  }
  0x19   :  { %149 = dma.done.wait [#allocation3], 1024  }
  0x1a   :  { %150 = vsyncadd [#allocation3], 4294966272 }
  0x1b   :  { %151 = dma.done.wait [#allocation6], 256  }
  0x1c   :  { %152 = vsyncadd [#allocation6], 4294967040  ;;  %v40_v0 = vld [vmem:[#allocation2] sm:$0xff]  ;;  %v41_v2 = vld [vmem:[#allocation2 + $0x8] sm:$0xff]  ;;  %s159_s0 = smov [#allocation7]  }
  0x1d   :  { %v48_v1 = vld [vmem:[#allocation5] sm:$0xff]  ;;  %v49_v4 = vld [vmem:[#allocation5 + $0x8] sm:$0xff]  ;;  %v42_v5 = vld [vmem:[#allocation2 + $0x10] sm:$0xff]  ;;  %s71_s21 = sshll.u32 %s159_s0, 4  ;;  %s72_s21 = int_to_ptr.vmem [resolvable:$true] %s71_s21 }
  0x1e   :  { %v50_v3 = vadd.f32 %v48_v1, %v40_v0  ;;  %v43_v6 = vld [vmem:[#allocation2 + $0x18] sm:$0xff]  ;;  %v51_v7 = vadd.f32 %v49_v4, %v41_v2  ;;  %v52_v8 = vadd.f32 %v48_v1, %v42_v5  ;;  %v44_v10 = vld [vmem:[#allocation2 + $0x20] sm:$0xff]  ;;  %v45_v11 = vld [vmem:[#allocation2 + $0x28] sm:$0xff]  ;;  %s129_s1 = scalar_lea.vmem %s72_s21, 1024  ;;  %p134_p11 = scmp.lt.s32.totalorder %s72_s21, %s72_s21 }
  0x1f   :  { %v53_v9 = vadd.f32 %v49_v4, %v43_v6  ;;  %v46_v12 = vld [vmem:[#allocation2 + $0x30] sm:$0xff]  ;;  %v54_v13 = vadd.f32 %v48_v1, %v44_v10  ;;  %v55_v14 = vadd.f32 %v49_v4, %v45_v11  ;;  %v47_v16 = vld [vmem:[#allocation2 + $0x38] sm:$0xff]  ;;  %p130_p10 = scmp.ne.s32.totalorder %s72_s21, %s129_s1  ;;  %p135_p12 = scmp.lt.s32.totalorder %s129_s1, %s129_s1 }
  0x20   :  { %58 = vst [vmem:[#allocation7] sm:$0xff] %v50_v3  ;;  %v56_v15 = vadd.f32 %v48_v1, %v46_v12  ;;  %59 = vst [vmem:[#allocation7 + $0x8] sm:$0xff] %v51_v7  ;;  %v57_v17 = vadd.f32 %v49_v4, %v47_v16 }
  0x21   :  { %60 = vst [vmem:[#allocation7 + $0x10] sm:$0xff] %v52_v8  ;;  %61 = vst [vmem:[#allocation7 + $0x18] sm:$0xff] %v53_v9  ;;  %p136_p13 = por %p135_p12, %p134_p11 }
  0x22   :  { %62 = vst [vmem:[#allocation7 + $0x20] sm:$0xff] %v54_v13  ;;  %63 = vst [vmem:[#allocation7 + $0x28] sm:$0xff] %v55_v14 }
  0x23   :  { %64 = vst [vmem:[#allocation7 + $0x30] sm:$0xff] %v56_v15  ;;  %65 = vst [vmem:[#allocation7 + $0x38] sm:$0xff] %v57_v17  ;;  %p137_p0 = pnand %p136_p13, %p130_p10 }
  0x25   :  { %140 = shalt.err (!%p137_p0)
}
  0x26   :  { %77 = dma.vmem_to_hbm [thread:$0]  %s72_s21, 1024, %s195_s2, [#allocation4], %s156_s12, %s156_s12, %s157_s13  }
  0x27   :  { %153 = dma.done.wait [#allocation4], 1024  }
  0x28   :  { %154 = vsyncadd [#allocation4], 4294966272 }
  0x29   :  { %81 = vsyncpa [#allocation3], 1 }
  0x2a   :  { %82 = vsyncpa [#allocation6], 1 }
  0x2b   :  { %83 = vsyncpa [#allocation4], 1 }

</bundles_post_ra>
